<compile_context>
chip_gen: v7x
topology: tpu7x:2x2x1
jax: 0.10.0
libtpu: 0.0.40
codegen_flags: <defaults>
</compile_context>

<pallas_src>
import functools

import jax
import jax.numpy as jnp
from jax.experimental import pallas as pl
from jax.experimental.pallas import tpu as pltpu


_VALUE_DTYPE = jnp.bfloat16  # storage dtype of V^T (feeds the bf16 value matmul)


# ---------------------------------------------------------------------------
# Stage 1: fused q/k/v projection (the three 1x1 convs as one packed matmul).
# ---------------------------------------------------------------------------
def _proj_kernel(xt_ref, wt_ref, b_ref, qt_ref, kt_ref, vt_ref, *, c8p):
    # xt_ref: (TN, C) f32 ; wt_ref: (C, 2*c8p + C) f32, columns = [q | k | v] ;
    # b_ref: (1, 2*c8p + C) f32.  c8p is a multiple of 128, so every column
    # slice below starts at a vreg-aligned lane offset.
    p = jnp.dot(xt_ref[...], wt_ref[...],
                preferred_element_type=jnp.float32) + b_ref[...]
    qt_ref[...] = p[:, :c8p]                               # (TN, c8p) f32
    kt_ref[...] = p[:, c8p:2 * c8p]                        # (TN, c8p) f32
    vt_ref[...] = p[:, 2 * c8p:].astype(vt_ref.dtype)      # (TN, C)   bf16


# ---------------------------------------------------------------------------
# Stage 2: attention + residual, tiled over query tokens.
# ---------------------------------------------------------------------------
def _attn_body(gamma_ref, qt_ref, k_ref, vt_ref, xt_ref, out_ref, att_ref):
    # qt_ref: (TQ, c8p) f32 ; k_ref: (c8p, N) f32 ; vt_ref: (N, C) bf16 ;
    # xt_ref/out_ref: (TQ, C) f32 ; att_ref: (TQ, N) att_dtype (optional).
    energy = jnp.dot(qt_ref[...], k_ref[...],
                     preferred_element_type=jnp.float32)            # (TQ, N)
    energy = energy - jnp.max(energy, axis=-1, keepdims=True)
    e = jnp.exp(energy)
    att = e * (1.0 / jnp.sum(e, axis=-1, keepdims=True))            # exact softmax
    out = jnp.dot(att.astype(vt_ref.dtype), vt_ref[...],
                  preferred_element_type=jnp.float32)               # (TQ, C)
    out_ref[...] = gamma_ref[0] * out + xt_ref[...]
    if att_ref is not None:
        att_ref[...] = att.astype(att_ref.dtype)


def _attn_kernel_with_att(gamma_ref, qt_ref, k_ref, vt_ref, xt_ref, out_ref, att_ref):
    _attn_body(gamma_ref, qt_ref, k_ref, vt_ref, xt_ref, out_ref, att_ref)


def _attn_kernel_no_att(gamma_ref, qt_ref, k_ref, vt_ref, xt_ref, out_ref):
    _attn_body(gamma_ref, qt_ref, k_ref, vt_ref, xt_ref, out_ref, None)


# ---------------------------------------------------------------------------
# Helpers.
# ---------------------------------------------------------------------------
def _pick_tile(n, target, quantum):
    """Largest multiple of `quantum` <= max(target, quantum) dividing n; n if none."""
    t = min(max(target, quantum), n)
    t -= t % quantum
    while t >= quantum:
        if n % t == 0:
            return t
        t -= quantum
    return n


def _vmem_limit_bytes():
    """~75% of physical per-core VMEM (96 MiB on 128 MiB parts, 48 MiB on v7x)."""
    try:
        cap = int(pltpu.get_tpu_info().vmem_capacity_bytes)
    except Exception:
        cap = 64 * (1 << 20)  # conservative (v7x per-TensorCore) fallback
    return (cap * 3) // 4


def _pack_qkv(params, c8p):
    """Pack [Wq; Wk; Wv] column-wise (transposed) with q/k zero-padded to c8p rows."""
    def pad_rows(a):
        return jnp.pad(a, ((0, c8p - a.shape[0]), (0, 0)))

    w = jnp.concatenate(
        [pad_rows(params["q_w"]), pad_rows(params["k_w"]), params["v_w"]], axis=0)
    b = jnp.concatenate(
        [pad_rows(params["q_b"]), pad_rows(params["k_b"]), params["v_b"]], axis=0)
    return (jnp.swapaxes(w, 0, 1).astype(jnp.float32),     # (C, 2*c8p + C)
            jnp.swapaxes(b, 0, 1).astype(jnp.float32))     # (1, 2*c8p + C)


def _attention_call(gamma, q_t, k, v_t, x_bnc, *, tq, att_dtype, return_attention,
                    resident_buffers, vmem_limit):
    b_sz, n, c = x_bnc.shape
    c8p = q_t.shape[-1]
    res_kw = {}
    if resident_buffers is not None:
        # K / V^T only change when the batch index changes -> single-buffer them.
        res_kw = dict(pipeline_mode=pl.Buffered(resident_buffers))
    in_specs = [
        pl.BlockSpec(memory_space=pltpu.SMEM),                             # gamma (1,)
        pl.BlockSpec((None, tq, c8p), lambda b, i: (b, i, 0)),             # Q^T tile
        pl.BlockSpec((None, c8p, n), lambda b, i: (b, 0, 0), **res_kw),    # K resident
        pl.BlockSpec((None, n, c), lambda b, i: (b, 0, 0), **res_kw),      # V^T resident
        pl.BlockSpec((None, tq, c), lambda b, i: (b, i, 0)),               # residual tile
    ]
    out_shape = jax.ShapeDtypeStruct((b_sz, n, c), jnp.float32)
    out_specs = pl.BlockSpec((None, tq, c), lambda b, i: (b, i, 0))
    kernel = _attn_kernel_no_att
    if return_attention:
        out_shape = (out_shape, jax.ShapeDtypeStruct((b_sz, n, n), att_dtype))
        out_specs = (out_specs, pl.BlockSpec((None, tq, n), lambda b, i: (b, i, 0)))
        kernel = _attn_kernel_with_att
    return pl.pallas_call(
        kernel,
        out_shape=out_shape,
        grid=(b_sz, n // tq),
        in_specs=in_specs,
        out_specs=out_specs,
        compiler_params=pltpu.CompilerParams(
            dimension_semantics=("parallel", "parallel"),
            vmem_limit_bytes=vmem_limit),
    )(gamma, q_t, k, v_t, x_bnc)


# ---------------------------------------------------------------------------
# Public forward pass.
# ---------------------------------------------------------------------------
def self_attn_forward(x_nchw, params, *, tq=256, tn=512,
                      att_dtype=jnp.bfloat16, return_attention=True):
    """Self_Attn forward.  x_nchw: (B, C, W, H) f32.

    Returns (out (B, C, W, H) f32, attention (B, N, N) att_dtype or None)."""
    B, C, W, H = x_nchw.shape
    N = W * H
    assert C >= 8 and C % 8 == 0, "in_dim must be a positive multiple of 8"
    c8 = C // 8
    c8p = ((c8 + 127) // 128) * 128   # pad q/k channels to a 128-lane boundary
    ctot = 2 * c8p + C

    tn = _pick_tile(N, tn, 8)         # stage-1 token tile (sublane dim)
    tq = _pick_tile(N, tq, 128)       # stage-2 query tile (multiple of 128)
    vmem_limit = _vmem_limit_bytes()

    # Tokens-major layout; same flatten order as torch's .view(B, C, W*H).
    x_bnc = jnp.swapaxes(x_nchw.reshape(B, C, N), 1, 2)      # (B, N, C)
    w_t, b_row = _pack_qkv(params, c8p)

    # ---- Stage 1: fused packed projection, tiled over tokens.
    q_t, k_t, v_t = pl.pallas_call(
        functools.partial(_proj_kernel, c8p=c8p),
        out_shape=(
            jax.ShapeDtypeStruct((B, N, c8p), jnp.float32),   # Q^T
            jax.ShapeDtypeStruct((B, N, c8p), jnp.float32),   # K^T
            jax.ShapeDtypeStruct((B, N, C), _VALUE_DTYPE),    # V^T
        ),
        grid=(B, N // tn),
        in_specs=[
            pl.BlockSpec((None, tn, C), lambda b, i: (b, i, 0)),   # x tokens tile
            pl.BlockSpec((C, ctot), lambda b, i: (0, 0)),          # packed weights
            pl.BlockSpec((1, ctot), lambda b, i: (0, 0)),          # packed biases
        ],
        out_specs=(
            pl.BlockSpec((None, tn, c8p), lambda b, i: (b, i, 0)),
            pl.BlockSpec((None, tn, c8p), lambda b, i: (b, i, 0)),
            pl.BlockSpec((None, tn, C), lambda b, i: (b, i, 0)),
        ),
        compiler_params=pltpu.CompilerParams(
            dimension_semantics=("parallel", "parallel"),
            vmem_limit_bytes=vmem_limit),
    )(x_bnc, w_t, b_row)

    # K^T -> K (c8p, N): tiny XLA transpose so stage 2 stays MXU-canonical.
    k = jnp.swapaxes(k_t, 1, 2)

    # ---- Stage 2: attention + residual.
    gamma = params["gamma"].astype(jnp.float32).reshape((1,))
    kwargs = dict(tq=tq, att_dtype=att_dtype, return_attention=return_attention,
                  vmem_limit=vmem_limit)
    try:
        result = _attention_call(gamma, q_t, k, v_t, x_bnc,
                                 resident_buffers=1, **kwargs)
    except Exception:
        # pl.Buffered(1) not supported on this runtime -> default double buffering.
        result = _attention_call(gamma, q_t, k, v_t, x_bnc,
                                 resident_buffers=None, **kwargs)

    out_bnc, attention = result if return_attention else (result, None)
    out = jnp.swapaxes(out_bnc, 1, 2).reshape(B, C, W, H)
    return out, attention


# ---------------------------------------------------------------------------
# Pure-JAX reference (full precision) and self-test.
# ---------------------------------------------------------------------------
def _reference(x_nchw, params):
    B, C, W, H = x_nchw.shape
    N = W * H
    x = x_nchw.reshape(B, C, N)
    hp = "highest"
    q = jnp.einsum("oc,bcn->bon", params["q_w"], x, precision=hp) + params["q_b"][None]
    k = jnp.einsum("oc,bcn->bon", params["k_w"], x, precision=hp) + params["k_b"][None]
    v = jnp.einsum("oc,bcn->bon", params["v_w"], x, precision=hp) + params["v_b"][None]
    energy = jnp.einsum("bci,bcj->bij", q, k, precision=hp)
    att = jax.nn.softmax(energy, axis=-1)
    out = jnp.einsum("bcj,bij->bci", v, att, precision=hp)
    out = params["gamma"][0] * out + x
    return out.reshape(B, C, W, H), att


if __name__ == "__main__":
    # Small shapes consistent with the module (in_dim must give in_dim // 8 >= 1).
    B, C, W, H = 2, 64, 16, 16
    C8 = C // 8
    N = W * H

    key = jax.random.PRNGKey(0)
    kx, kq, kk, kv, kqb, kkb, kvb = jax.random.split(key, 7)

    x = jax.random.normal(kx, (B, C, W, H), dtype=jnp.float32)
    params = {
        # 1x1 conv weights (out_channels, in_channels); biases as column vectors.
        "q_w": 0.1 * jax.random.normal(kq, (C8, C), dtype=jnp.float32),
        "q_b": 0.1 * jax.random.normal(kqb, (C8, 1), dtype=jnp.float32),
        "k_w": 0.1 * jax.random.normal(kk, (C8, C), dtype=jnp.float32),
        "k_b": 0.1 * jax.random.normal(kkb, (C8, 1), dtype=jnp.float32),
        "v_w": 0.1 * jax.random.normal(kv, (C, C), dtype=jnp.float32),
        "v_b": 0.1 * jax.random.normal(kvb, (C, 1), dtype=jnp.float32),
        # nn.Parameter(torch.zeros(1)) in the module; nonzero here so the
        # attention branch actually contributes to the output under test.
        "gamma": jnp.array([0.5], dtype=jnp.float32),
    }

    # tq=128 / tn=128 exercise the multi-tile paths (N=256 -> 2 tiles per axis).
    out, attention = self_attn_forward(x, params, tq=128, tn=128)
    out = jax.block_until_ready(out)
    attention = jax.block_until_ready(attention)

    ref_out, ref_att = _reference(x, params)
    assert out.shape == (B, C, W, H) and attention.shape == (B, N, N)
    err_out = float(jnp.max(jnp.abs(out - ref_out)))
    err_att = float(jnp.max(jnp.abs(attention.astype(jnp.float32) - ref_att)))
    # Energy/softmax/residual run in f32; only the value matmul and the returned
    # attention map use bf16, so mixed-precision tolerances apply.
    assert err_out < 1e-2, f"out max error {err_out}"
    assert err_att < 5e-3, f"attention max error {err_att}"

    print("KERNEL_OK")
</pallas_src>

<mosaic_0001>
module attributes {stable_mosaic.version = 11 : i64} {
  func.func @_proj_kernel(%arg0: i32, %arg1: i32, %arg2: memref<1x128x64xf32, #tpu.memory_space<vmem>>, %arg3: memref<64x320xf32, #tpu.memory_space<vmem>>, %arg4: memref<1x320xf32, #tpu.memory_space<vmem>>, %arg5: memref<1x128x128xf32, #tpu.memory_space<vmem>>, %arg6: memref<1x128x128xf32, #tpu.memory_space<vmem>>, %arg7: memref<1x128x64xbf16, #tpu.memory_space<vmem>>) attributes {dimension_semantics = [#tpu.dimension_semantics<parallel>, #tpu.dimension_semantics<parallel>], iteration_bounds = array<i64: 2, 2>, scalar_prefetch = 0 : i64, scratch_operands = 0 : i64, tpu.core_type = #tpu.core_type<tc>, window_params = [{transform_indices = @transform_0, window_bounds = array<i64: 1, 128, 64>}, {pipeline_mode = #tpu.pipeline_mode<synchronous>, transform_indices = @transform_1, window_bounds = array<i64: 64, 320>}, {pipeline_mode = #tpu.pipeline_mode<synchronous>, transform_indices = @transform_2, window_bounds = array<i64: 1, 320>}, {transform_indices = @transform_3, window_bounds = array<i64: 1, 128, 128>}, {transform_indices = @transform_4, window_bounds = array<i64: 1, 128, 128>}, {transform_indices = @transform_5, window_bounds = array<i64: 1, 128, 64>}]} {
    %c0 = arith.constant 0 : index
    %c0_0 = arith.constant 0 : index
    %c0_1 = arith.constant 0 : index
    %0 = vector.load %arg2[%c0, %c0_0, %c0_1] : memref<1x128x64xf32, #tpu.memory_space<vmem>>, vector<1x128x64xf32>
    %1 = vector.shape_cast %0 : vector<1x128x64xf32> to vector<128x64xf32>
    %c0_2 = arith.constant 0 : index
    %c0_3 = arith.constant 0 : index
    %2 = vector.load %arg3[%c0_2, %c0_3] : memref<64x320xf32, #tpu.memory_space<vmem>>, vector<64x320xf32>
    %cst = arith.constant dense<0.000000e+00> : vector<128x320xf32>
    %3 = tpu.matmul %1, %2, %cst {dimension_numbers = #tpu.dot_dimension_numbers<[1], [0], [0], [1], [0, 0, 1, 1], [], []>} : vector<128x64xf32>, vector<64x320xf32>, vector<128x320xf32> -> vector<128x320xf32>
    %c0_4 = arith.constant 0 : index
    %c0_5 = arith.constant 0 : index
    %4 = vector.load %arg4[%c0_4, %c0_5] : memref<1x320xf32, #tpu.memory_space<vmem>>, vector<1x320xf32>
    %5 = vector.broadcast %4 : vector<1x320xf32> to vector<128x320xf32>
    %6 = arith.addf %3, %5 : vector<128x320xf32>
    %7 = vector.extract_strided_slice %6 {offsets = [0, 0], sizes = [128, 128], strides = [1, 1]} : vector<128x320xf32> to vector<128x128xf32>
    %c0_6 = arith.constant 0 : index
    %c0_7 = arith.constant 0 : index
    %c0_8 = arith.constant 0 : index
    %8 = vector.load %arg5[%c0_6, %c0_7, %c0_8] : memref<1x128x128xf32, #tpu.memory_space<vmem>>, vector<1x128x128xf32>
    %9 = vector.shape_cast %8 : vector<1x128x128xf32> to vector<128x128xf32>
    %10 = vector.shape_cast %7 : vector<128x128xf32> to vector<1x128x128xf32>
    tpu.vector_store %arg5[%c0_6, %c0_7, %c0_8], %10 {strides = array<i32>} : memref<1x128x128xf32, #tpu.memory_space<vmem>>, vector<1x128x128xf32>,
    %11 = vector.extract_strided_slice %6 {offsets = [0, 128], sizes = [128, 128], strides = [1, 1]} : vector<128x320xf32> to vector<128x128xf32>
    %c0_9 = arith.constant 0 : index
    %c0_10 = arith.constant 0 : index
    %c0_11 = arith.constant 0 : index
    %12 = vector.load %arg6[%c0_9, %c0_10, %c0_11] : memref<1x128x128xf32, #tpu.memory_space<vmem>>, vector<1x128x128xf32>
    %13 = vector.shape_cast %12 : vector<1x128x128xf32> to vector<128x128xf32>
    %14 = vector.shape_cast %11 : vector<128x128xf32> to vector<1x128x128xf32>
    tpu.vector_store %arg6[%c0_9, %c0_10, %c0_11], %14 {strides = array<i32>} : memref<1x128x128xf32, #tpu.memory_space<vmem>>, vector<1x128x128xf32>,
    %15 = vector.extract_strided_slice %6 {offsets = [0, 256], sizes = [128, 64], strides = [1, 1]} : vector<128x320xf32> to vector<128x64xf32>
    %16 = arith.truncf %15 : vector<128x64xf32> to vector<128x64xbf16>
    %c0_12 = arith.constant 0 : index
    %c0_13 = arith.constant 0 : index
    %c0_14 = arith.constant 0 : index
    %17 = vector.load %arg7[%c0_12, %c0_13, %c0_14] : memref<1x128x64xbf16, #tpu.memory_space<vmem>>, vector<1x128x64xbf16>
    %18 = vector.shape_cast %17 : vector<1x128x64xbf16> to vector<128x64xbf16>
    %19 = vector.shape_cast %16 : vector<128x64xbf16> to vector<1x128x64xbf16>
    tpu.vector_store %arg7[%c0_12, %c0_13, %c0_14], %19 {strides = array<i32>} : memref<1x128x64xbf16, #tpu.memory_space<vmem>>, vector<1x128x64xbf16>,
    return
  }
  func.func @transform_0(%arg0: i32, %arg1: i32) -> (i32, i32, i32) {
    %c0_i32 = arith.constant 0 : i32
    %c0_i32_0 = arith.constant 0 : i32
    return %arg0, %arg1, %c0_i32 : i32, i32, i32
  }
  func.func @transform_1(%arg0: i32, %arg1: i32) -> (i32, i32) {
    %c0_i32 = arith.constant 0 : i32
    %c0_i32_0 = arith.constant 0 : i32
    %c0_i32_1 = arith.constant 0 : i32
    return %c0_i32, %c0_i32_0 : i32, i32
  }
  func.func @transform_2(%arg0: i32, %arg1: i32) -> (i32, i32) {
    %c0_i32 = arith.constant 0 : i32
    %c0_i32_0 = arith.constant 0 : i32
    %c0_i32_1 = arith.constant 0 : i32
    return %c0_i32, %c0_i32_0 : i32, i32
  }
  func.func @transform_3(%arg0: i32, %arg1: i32) -> (i32, i32, i32) {
    %c0_i32 = arith.constant 0 : i32
    %c0_i32_0 = arith.constant 0 : i32
    return %arg0, %arg1, %c0_i32 : i32, i32, i32
  }
  func.func @transform_4(%arg0: i32, %arg1: i32) -> (i32, i32, i32) {
    %c0_i32 = arith.constant 0 : i32
    %c0_i32_0 = arith.constant 0 : i32
    return %arg0, %arg1, %c0_i32 : i32, i32, i32
  }
  func.func @transform_5(%arg0: i32, %arg1: i32) -> (i32, i32, i32) {
    %c0_i32 = arith.constant 0 : i32
    %c0_i32_0 = arith.constant 0 : i32
    return %arg0, %arg1, %c0_i32 : i32, i32, i32
  }
}

</mosaic_0001>

<bundles_post_ra>
// kernel: tpu_custom_call.1
= control target key start
LH: loop header
LB: loop body
LE: loop exit
PB: predicated region body
PF: predicated region fallthrough
CT: control target
= control target key end

     0   :  { %11 = vsyncpa [#allocation3], 0  ;;  %s1925_s0 = inlined_call_operand.vmem [shape: f32[2,256,64], index: 0, kind: input, shape index: {}]   ;;  %s1926_s1 = inlined_call_operand.vmem [shape: f32[64,320], index: 1, kind: input, shape index: {}]   ;;  %s1927_s2 = inlined_call_operand.vmem [shape: f32[1,320], index: 2, kind: input, shape index: {}]   ;;  %s1928_s3 = inlined_call_operand.hbm [shape: f32[2,256,128], index: 3, kind: output, shape index: {0}]   ;;  %s1929_s4 = inlined_call_operand.hbm [shape: f32[2,256,128], index: 4, kind: output, shape index: {1}]   ;;  %s1930_s5 = inlined_call_operand.vmem [shape: bf16[2,256,64], index: 5, kind: output, shape index: {2}]  }
   0x1   :  { %13 = vsyncpa [#allocation3 + $0x1], 0 }
   0x2   :  { %14 = vsyncpa [#allocation5], 0 }
   0x3   :  { %16 = vsyncpa [#allocation5 + $0x1], 0  ;;  %s1455_s18 = smov 0   ;;  %s1457_s19 = smov 0  }
   0x4   :  { %s1459_s20 = smov 0   ;;  %s1461_s21 = smov 0  }
   0x5   :  { %s1463_s22 = smov 0   ;;  %s1465_s23 = smov 0  }
   0x6   :  { %s1467_s24 = smov 0   ;;  %s1469_s25 = smov 0  }
   0x7 LB: > { %s1022_s26 = sadd.s32 4294967295, %s1418_s25   ;;  %s1023_s27 = sadd.s32 4294967294, %s1418_s25   ;;  %s1418_s25 = sphi %s1469_s25, %s22_s25   ;;  %s1414_s24 = sphi %s1467_s24, %s1941_s24   ;;  %s1410_s23 = sphi %s1465_s23, %s1940_s23   ;;  %s1406_s22 = sphi %s1463_s22, %s1939_s22   ;;  %s1402_s21 = sphi %s1461_s21, %s1938_s21   ;;  %s1398_s20 = sphi %s1459_s20, %s1937_s20   ;;  %s1394_s19 = sphi %s1457_s19, %s1936_s19   ;;  %s1390_s18 = sphi %s1455_s18, %s1935_s18  }
   0x8   : > { %s31_s28 = sadd.s32 1, %s1410_s23  ;;  %s34_s29 = sadd.s32 1, %s1414_s24 }
   0x9   : > { %p32_p0 = scmp.ge.s32.totalorder %s31_s28, 2  ;;  %p123_p1 = scmp.ne.s32.totalorder %s1398_s20, %s1394_s19 }
   0xa   : > { %p124_p2 = scmp.eq.s32.totalorder %s1022_s26, 3  ;;  %p129_p5 = scmp.ne.s32.totalorder %s1394_s19, %s1390_s18 }
   0xb   : > { %s1943_s28 = smov (%p32_p0, %s31_s28), 0  ;;  %s1945_s29 = smov (!%p32_p0, %s34_s29), %s1414_s24 }
   0xc   : > { %s109_s30 = ssub.s32 %s1410_s23, %s1943_s28  ;;  %p1506_p3 = por %p124_p2, %p123_p1 }
   0xd   : > { %p36_p4 = scmp.ge.s32.totalorder %s1945_s29, 2  ;;  %p130_p6 = scmp.eq.s32.totalorder %s1023_s27, 3 }
   0xe   : > { %p1026_p7 = scmp.ge.s32.totalorder %s1418_s25, 1  ;;  %p223_p9 = scmp.lt.s32.totalorder %s1418_s25, 5 }
   0xf   : > { %s1947_s29 = smov (%p36_p4, %s1945_s29), 0  ;;  %p1515_p8 = por %p130_p6, %p129_p5 }
  0x10   : > { %s108_s8 = ssub.s32 %s1414_s24, %s1947_s29  ;;  %s113_s9 = sadd.s32 1, %s1398_s20 }
  0x11   : > { %s110_s10 = sor.u32 %s109_s30, %s108_s8  ;;  %p224_p10 = pnand %p1026_p7, %p223_p9 }
  0x12   : > { %p111_p11 = scmp.eq.s32.totalorder %s110_s10, 0  ;;  %v308_v0 = vld [vmem:[%s1926_s1 + $0x8] sm:$0xff] (!%p224_p10)  ;;  %v311_v1 = vld [vmem:[%s1926_s1 + $0x20] sm:$0xff] (!%p224_p10)  ;;  %s1536_s26 = sshll.u32 (!%p224_p10), %s1402_s21, 4  ;;  %v310_v4 = vld [vmem:[%s1926_s1 + $0x18] sm:$0xff] (!%p224_p10)  ;;  %v1420_v7 = vmov (!%p224_p10), 0.0   ;;  %v333_v53 = vlaneseq (!%p224_p10) }
  0x13   : > { %227 = sbr.rel (%p224_p10) target bundleno = 336 (0x150), region = 32  ;;  %v307_v2 = vld [vmem:[%s1926_s1] sm:$0xff] (!%p224_p10)  ;;  %p270_p12 = scmp.lt.s32.totalorder (!%p224_p10), %s1406_s22, 1  ;;  %v1173_v3 = vpack.c.bf16 (!%p224_p10), %v311_v1, %v308_v0  ;;  %v314_v5 = vld [vmem:[%s1926_s1 + $0x38] sm:$0xff] (!%p224_p10)  ;;  %v317_v6 = vld [vmem:[%s1926_s1 + $0x50] sm:$0xff] (!%p224_p10)  ;;  %533 = vmatprep.mubr.f32.mxu1 (!%p224_p10), %v1420_v7  ;;  %461 = vmatprep.mubr.f32.mxu0 (!%p224_p10), %v1420_v7  ;;  %vm348_vm0 = vcmask (!%p224_p10), 523264  }
  0x14   : > { %s1524_s11 = scalar_select %p111_p11, %s1398_s20, %s113_s9  }
  0x15   : > { %p272_p13 = scmp.lt.s32.totalorder (!%p224_p10), %s1536_s26, 31  ;;  %v1175_v8 = vpack.c.bf16 (!%p224_p10), %v310_v4, %v307_v2  ;;  %v1177_v9 = vpack.c.bf16 (!%p224_p10), %v317_v6, %v314_v5  ;;  %v313_v10 = vld [vmem:[%s1926_s1 + $0x30] sm:$0xff] (!%p224_p10)  ;;  %v316_v11 = vld [vmem:[%s1926_s1 + $0x48] sm:$0xff] (!%p224_p10)  ;;  %1205 = vmatprep.subr.bf16.mxu1 (!%p224_p10), %v1173_v3  ;;  %1174 = vmatprep.subr.bf16.mxu0 (!%p224_p10), %v1173_v3  ;;  %v323_v13 = vld [vmem:[%s1926_s1 + $0x80] sm:$0xff] (!%p224_p10)  ;;  %v334_v54 = vshrl.u32 (!%p224_p10), %v333_v53, 7  ;;  %vm799_vm1 = vcmask (!%p224_p10), 519168  }
  0x16   : > { %v320_v12 = vld [vmem:[%s1926_s1 + $0x68] sm:$0xff] (!%p224_p10)  ;;  %v1179_v14 = vpack.c.bf16 (!%p224_p10), %v316_v11, %v313_v10  ;;  %v319_v16 = vld [vmem:[%s1926_s1 + $0x60] sm:$0xff] (!%p224_p10)  ;;  %v322_v17 = vld [vmem:[%s1926_s1 + $0x78] sm:$0xff] (!%p224_p10)  ;;  %s1421_s13 = smov (!%p224_p10), [#allocation2]  }
  0x17   : > { %1209 = vmatpush1.bf16.msra.mxu1 (!%p224_p10), %v1175_v8  ;;  %1176 = vmatpush1.bf16.msra.mxu0 (!%p224_p10), %v1175_v8  ;;  %v1181_v15 = vpack.c.bf16 (!%p224_p10), %v323_v13, %v320_v12  ;;  %v326_v18 = vld [vmem:[%s1926_s1 + $0x98] sm:$0xff] (!%p224_p10)  ;;  %v329_v19 = vld [vmem:[%s1926_s1 + $0xb0] sm:$0xff] (!%p224_p10)  ;;  %v1183_v20 = vpack.c.bf16 (!%p224_p10), %v322_v17, %v319_v16  ;;  %v328_v23 = vld [vmem:[%s1926_s1 + $0xa8] sm:$0xff] (!%p224_p10)  ;;  %v335_v55 = vsub.s32 (!%p224_p10), 0, %v334_v54  ;;  %v339_v57 = vsub.s32 (!%p224_p10), 1, %v334_v54  ;;  %s1296_s15 = sshll.u32 (!%p224_p10), %s1421_s13, 4  ;;  %s1297_s15 = int_to_ptr.vmem [resolvable:$false] %s1296_s15 }
  0x18   : > { %1206 = vmatprep.subr.bf16.mxu1 (!%p224_p10), %v1177_v9  ;;  %1178 = vmatprep.subr.bf16.mxu0 (!%p224_p10), %v1177_v9  ;;  %v1185_v21 = vpack.c.bf16 (!%p224_p10), %v329_v19, %v326_v18  ;;  %v325_v22 = vld [vmem:[%s1926_s1 + $0x90] sm:$0xff] (!%p224_p10)  ;;  %v312_v25 = vld [vmem:[%s1926_s1 + $0x28] sm:$0xff] (!%p224_p10)  ;;  %v315_v28 = vld [vmem:[%s1926_s1 + $0x40] sm:$0xff] (!%p224_p10)  ;;  %v343_v18 = vsub.s32 (!%p224_p10), 2, %v334_v54 }
  0x19   : > { %v309_v24 = vld [vmem:[%s1926_s1 + $0x10] sm:$0xff] (!%p224_p10)  ;;  %v1187_v26 = vpack.c.bf16 (!%p224_p10), %v328_v23, %v325_v22  ;;  %v318_v29 = vld [vmem:[%s1926_s1 + $0x58] sm:$0xff] (!%p224_p10)  ;;  %v324_v34 = vld [vmem:[%s1926_s1 + $0x88] sm:$0xff] (!%p224_p10) }
  0x1a   : > { %s271_s27 = scalar_select %p270_p12, %s1406_s22, 1  ;;  %v1189_v27 = vpack.c.bf16 %v312_v25, %v309_v24  ;;  %v1193_v32 = vpack.c.bf16 %v318_v29, %v315_v28  ;;  %v321_v33 = vld [vmem:[%s1926_s1 + $0x70] sm:$0xff]  ;;  %v327_v38 = vld [vmem:[%s1926_s1 + $0xa0] sm:$0xff]  ;;  %v330_v39 = vld [vmem:[%s1926_s1 + $0xb8] sm:$0xff] }
  0x1b   : > { %s273_s9 = scalar_select %p272_p13, %s1536_s26, 31  ;;  %1210 = vmatpush1.bf16.msra.mxu1 %v1179_v14  ;;  %1180 = vmatpush1.bf16.msra.mxu0 %v1179_v14  ;;  %v1197_v37 = vpack.c.bf16 %v324_v34, %v321_v33  ;;  %v1201_v42 = vpack.c.bf16 %v330_v39, %v327_v38  ;;  %v331_v56 = vld [vmem:[%s1927_s2] sm:$0x7] }
  0x1c   : > { %s1030_s10 = sshll.u32 %s271_s27, 5  ;;  %1207 = vmatprep.subr.bf16.mxu1 %v1181_v15  ;;  %1182 = vmatprep.subr.bf16.mxu0 %v1181_v15  ;;  %v1690_v58 = vrot.slane %v331_v56, %v335_v55  ;;  %v1692_v59 = vrot.slane %v331_v56, %v339_v57 }
  0x1d   : > { %s1579_s27 = sadd.s32 %s1030_s10, %s273_s9 }
  0x1e   : > { %s1031_s14 = sshll.u32 %s1579_s27, 3  ;;  %s1034_s10 = sshll.u32 %s1579_s27, 2 }
  0x1f   : > { %1211 = vmatpush1.bf16.msra.mxu1 %v1183_v20  ;;  %1184 = vmatpush1.bf16.msra.mxu0 %v1183_v20  ;;  %s1597_s8 = scalar_lea.vmem %s1925_s0, %s1031_s14  ;;  %s1738_s12 = scalar_lea.vmem %s1930_s5, %s1034_s10 }
  0x20   : > { %1208 = vmatprep.subr.bf16.mxu1 %v1185_v21  ;;  %1186 = vmatprep.subr.bf16.mxu0 %v1185_v21  ;;  %v1606_v30 = vld [vmem:[%s1597_s8 + $0x60] sm:$0xff]  ;;  %v304_v35 = vld [vmem:[%s1597_s8 + $0x68] sm:$0xff]  ;;  %v305_v40 = vld [vmem:[%s1597_s8 + $0x70] sm:$0xff]  ;;  %s1086_s27 = sshll.u32 %s1406_s22, 5  ;;  %s1298_s10 = scalar_lea.vmem %s1297_s15, 4096 }
  0x21   : > { %v291_v31 = vld [vmem:[%s1597_s8] sm:$0xff]  ;;  %v292_v36 = vld [vmem:[%s1597_s8 + $0x8] sm:$0xff]  ;;  %v293_v41 = vld [vmem:[%s1597_s8 + $0x10] sm:$0xff]  ;;  %s1785_s22 = sadd.s32 %s1086_s27, %s1536_s26 }
  0x22   : > { %v306_v43 = vld [vmem:[%s1597_s8 + $0x78] sm:$0xff]  ;;  %v295_v45 = vld [vmem:[%s1597_s8 + $0x20] sm:$0xff]  ;;  %v296_v46 = vld [vmem:[%s1597_s8 + $0x28] sm:$0xff]  ;;  %s1087_s26 = sshll.u32 %s1785_s22, 7 }
  0x23   : > { %1212 = vmatpush1.bf16.msra.mxu1 %v1187_v26  ;;  %1188 = vmatpush1.bf16.msra.mxu0 %v1187_v26  ;;  %v294_v44 = vld [vmem:[%s1597_s8 + $0x18] sm:$0xff]  ;;  %v297_v47 = vld [vmem:[%s1597_s8 + $0x30] sm:$0xff]  ;;  %v299_v49 = vld [vmem:[%s1597_s8 + $0x40] sm:$0xff]  ;;  %s1816_s30 = scalar_lea.hbm %s1929_s4, %s1087_s26 }
  0x24   : > { %1190 = vmatprep.subr.bf16.mxu1 %v1189_v27  ;;  %v298_v48 = vld [vmem:[%s1597_s8 + $0x38] sm:$0xff]  ;;  %v300_v50 = vld [vmem:[%s1597_s8 + $0x48] sm:$0xff]  ;;  %v301_v51 = vld [vmem:[%s1597_s8 + $0x50] sm:$0xff] }
  0x25   : > { %v302_v52 = vld [vmem:[%s1597_s8 + $0x58] sm:$0xff]  ;;  %s1684_s8 = sand.u32 1, %s1394_s19  }
  0x26   : > { %1047 = vmatmul.mubr.msk.f32.vlgmr.msra.gmra.mrb[0].mxu1 %vm348_vm0, %v1606_v30  ;;  %1035 = vmatmul.mubr.msk.f32.vlgmr.msra.gmra.mrb[0].mxu0 %vm348_vm0, %v291_v31  ;;  %s1027_s14 = sshll.u32 %s1684_s8, 7 }
  0x27   : > { %1192 = vmatpush3.bf16.msra.mxu1 %v1189_v27  ;;  %539 = vmatprep.mubr.f32.mxu1 %v1420_v7  ;;  %s1698_s16 = scalar_lea.vmem [#allocation2], %s1027_s14  ;;  %s1702_s9 = scalar_lea.vmem [#allocation4], %s1027_s14  ;;  %v1724_v27 = vrot.slane %v331_v56, %v343_v18 }
  0x28   : > { %467 = vmatprep.mubr.f32.mxu0 %v1420_v7  ;;  %1194 = vmatprep.subr.bf16.mxu1 %v1193_v32  ;;  %s846_s21 = sshll.u32 %s1698_s16, 4  ;;  %s1807_s14 = scalar_lea.hbm %s1928_s3, %s1087_s26  ;;  %s1821_s21 = int_to_ptr.vmem [resolvable:$true] %s846_s21 }
  0x29   : > { %s864_s27 = sshll.u32 %s1702_s9, 4  ;;  %s1292_s26 = scalar_lea.vmem %s1821_s21, 2048  ;;  %s1833_s27 = int_to_ptr.vmem [resolvable:$true] %s864_s27 }
  0x2a   : > { %1048 = vmatmul.mubr.msk.f32.gmra.mrb[2].mxu1 %vm348_vm0, %v304_v35  ;;  %1036 = vmatmul.mubr.msk.f32.gmra.mrb[2].mxu0 %vm348_vm0, %v292_v36  ;;  %p1293_p0 = scmp.ne.s32.totalorder %s1821_s21, %s1292_s26  ;;  %p1299_p4 = scmp.lt.s32.totalorder %s1821_s21, %s1297_s15 }
  0x2b   : > { %1196 = vmatpush3.bf16.msra.mxu1 %v1193_v32  ;;  %545 = vmatprep.mubr.f32.mxu1 %v1420_v7  ;;  %p1300_p5 = scmp.lt.s32.totalorder %s1298_s10, %s1292_s26 }
  0x2c   : > { %473 = vmatprep.mubr.f32.mxu0 %v1420_v7  ;;  %1198 = vmatprep.subr.bf16.mxu1 %v1197_v37  ;;  %p1294_p1 = pnand %p1293_p0, %p1506_p3 }
  0x2d   : > { %p1301_p6 = por %p1300_p5, %p1299_p4 }
  0x2e   : > { %1049 = vmatmul.mubr.msk.f32.gmra.mrb[4].mxu1 %vm348_vm0, %v305_v40  ;;  %1037 = vmatmul.mubr.msk.f32.gmra.mrb[4].mxu0 %vm348_vm0, %v293_v41  ;;  %p1295_p2 = pneg %p1294_p1 }
  0x2f   : > { %1200 = vmatpush3.bf16.msra.mxu1 %v1197_v37  ;;  %551 = vmatprep.mubr.f32.mxu1 %v1420_v7 }
  0x30   : > { %479 = vmatprep.mubr.f32.mxu0 %v1420_v7  ;;  %1202 = vmatprep.subr.bf16.mxu1 %v1201_v42  ;;  %p1302_p7 = pnand %p1301_p6, %p1295_p2 }
  0x32   : > { %1050 = vmatmul.mubr.msk.f32.gmra.mrb[6].mxu1 %vm348_vm0, %v306_v43  ;;  %1038 = vmatmul.mubr.msk.f32.gmra.mrb[6].mxu0 %vm348_vm0, %v294_v44 }
  0x33   : > { %1204 = vmatpush3.bf16.msra.mxu1 %v1201_v42  ;;  %1149 = vmatprep.mubr.msk.f32.mxu1 %vm348_vm0, %v291_v31 }
  0x34   : > { %485 = vmatprep.mubr.f32.mxu0 %v1420_v7 }
  0x36   : > { %1150 = vmatmul.mubr.msk.f32.vlgmr.msra.gmra.mrb[8].mxu1 %vm348_vm0, %v292_v36  ;;  %1039 = vmatmul.mubr.msk.f32.gmra.mrb[8].mxu0 %vm348_vm0, %v295_v45 }
  0x37   : > { %1152 = vmatprep.mubr.msk.f32.mxu1 %vm348_vm0, %v293_v41  ;;  %491 = vmatprep.mubr.f32.mxu0 %v1420_v7 }
  0x3a   : > { %1153 = vmatmul.mubr.msk.f32.gmra.mrb[10].mxu1 %vm348_vm0, %v294_v44  ;;  %1040 = vmatmul.mubr.msk.f32.gmra.mrb[10].mxu0 %vm348_vm0, %v296_v46 }
  0x3b   : > { %1155 = vmatprep.mubr.msk.f32.mxu1 %vm348_vm0, %v295_v45  ;;  %497 = vmatprep.mubr.f32.mxu0 %v1420_v7 }
  0x3e   : > { %1156 = vmatmul.mubr.msk.f32.gmra.mrb[12].mxu1 %vm348_vm0, %v296_v46  ;;  %1041 = vmatmul.mubr.msk.f32.gmra.mrb[12].mxu0 %vm348_vm0, %v297_v47 }
  0x3f   : > { %1158 = vmatprep.mubr.msk.f32.mxu1 %vm348_vm0, %v297_v47  ;;  %503 = vmatprep.mubr.f32.mxu0 %v1420_v7 }
  0x42   : > { %1159 = vmatmul.mubr.msk.f32.gmra.mrb[14].mxu1 %vm348_vm0, %v298_v48  ;;  %1042 = vmatmul.mubr.msk.f32.gmra.mrb[14].mxu0 %vm348_vm0, %v298_v48 }
  0x43   : > { %1161 = vmatprep.mubr.msk.f32.mxu1 %vm348_vm0, %v299_v49  ;;  %509 = vmatprep.mubr.f32.mxu0 %v1420_v7 }
  0x46   : > { %1162 = vmatmul.mubr.msk.f32.gmra.mrb[16].mxu1 %vm348_vm0, %v300_v50  ;;  %1043 = vmatmul.mubr.msk.f32.gmra.mrb[16].mxu0 %vm348_vm0, %v299_v49 }
  0x47   : > { %1164 = vmatprep.mubr.msk.f32.mxu1 %vm348_vm0, %v301_v51  ;;  %515 = vmatprep.mubr.f32.mxu0 %v1420_v7 }
  0x4a   : > { %1165 = vmatmul.mubr.msk.f32.gmra.mrb[18].mxu1 %vm348_vm0, %v302_v52  ;;  %1044 = vmatmul.mubr.msk.f32.gmra.mrb[18].mxu0 %vm348_vm0, %v300_v50 }
  0x4b   : > { %1167 = vmatprep.mubr.msk.f32.mxu1 %vm348_vm0, %v1606_v30  ;;  %521 = vmatprep.mubr.f32.mxu0 %v1420_v7 }
  0x4e   : > { %1168 = vmatmul.mubr.msk.f32.gmra.mrb[20].mxu1 %vm348_vm0, %v304_v35  ;;  %1045 = vmatmul.mubr.msk.f32.gmra.mrb[20].mxu0 %vm348_vm0, %v301_v51 }
  0x4f   : > { %1170 = vmatprep.mubr.msk.f32.mxu1 %vm348_vm0, %v305_v40  ;;  %527 = vmatprep.mubr.f32.mxu0 %v1420_v7 }
  0x52   : > { %1171 = vmatmul.mubr.msk.f32.gmra.mrb[22].mxu1 %vm348_vm0, %v306_v43  ;;  %1046 = vmatmul.mubr.msk.f32.gmra.mrb[22].mxu0 %vm348_vm0, %v302_v52 }
  0xf9   : > { %v535_v60 = vpop.f32.mrb[0].mxu1  ;;  %v463_v61 = vpop.f32.mrb[0].mxu0 }
  0xfa   : > { %v536_v62 = vadd.f32 %v535_v60, %v1690_v58  ;;  %v464_v63 = vadd.f32 %v463_v61, %v1690_v58  ;;  %v537_v0 = vpop.f32.mrb[1].mxu1  ;;  %v465_v1 = vpop.f32.mrb[1].mxu0 }
  0xfb   : > { %v538_v2 = vadd.f32 %v537_v0, %v1692_v59  ;;  %v466_v3 = vadd.f32 %v465_v1, %v1692_v59 }
  0xfc   : > { %715 = vst [vmem:[%s1698_s16 + $0x60] sm:$0xff] %v536_v62  ;;  %703 = vst [vmem:[%s1698_s16] sm:$0xff] %v464_v63 }
  0xfd   : > { %731 = vst [vmem:[%s1702_s9 + $0x60] sm:$0xff] %v538_v2  ;;  %719 = vst [vmem:[%s1702_s9] sm:$0xff] %v466_v3  ;;  %v541_v4 = vpop.f32.mrb[2].mxu1  ;;  %v469_v5 = vpop.f32.mrb[2].mxu0 }
  0xfe   : > { %v542_v6 = vadd.f32 %v541_v4, %v1690_v58  ;;  %v470_v7 = vadd.f32 %v469_v5, %v1690_v58  ;;  %v543_v8 = vpop.f32.mrb[3].mxu1  ;;  %v471_v9 = vpop.f32.mrb[3].mxu0 }
  0xff   : > { %v544_v10 = vadd.f32 %v543_v8, %v1692_v59  ;;  %v472_v11 = vadd.f32 %v471_v9, %v1692_v59 }
 0x100   : > { %716 = vst [vmem:[%s1698_s16 + $0x68] sm:$0xff] %v542_v6  ;;  %704 = vst [vmem:[%s1698_s16 + $0x8] sm:$0xff] %v470_v7 }
 0x101   : > { %732 = vst [vmem:[%s1702_s9 + $0x68] sm:$0xff] %v544_v10  ;;  %720 = vst [vmem:[%s1702_s9 + $0x8] sm:$0xff] %v472_v11  ;;  %v547_v12 = vpop.f32.mrb[4].mxu1  ;;  %v475_v13 = vpop.f32.mrb[4].mxu0 }
 0x102   : > { %v548_v14 = vadd.f32 %v547_v12, %v1690_v58  ;;  %v476_v15 = vadd.f32 %v475_v13, %v1690_v58  ;;  %v549_v16 = vpop.f32.mrb[5].mxu1  ;;  %v477_v17 = vpop.f32.mrb[5].mxu0 }
 0x103   : > { %v550_v19 = vadd.f32 %v549_v16, %v1692_v59  ;;  %v478_v20 = vadd.f32 %v477_v17, %v1692_v59 }
 0x104   : > { %717 = vst [vmem:[%s1698_s16 + $0x70] sm:$0xff] %v548_v14  ;;  %705 = vst [vmem:[%s1698_s16 + $0x10] sm:$0xff] %v476_v15 }
 0x105   : > { %733 = vst [vmem:[%s1702_s9 + $0x70] sm:$0xff] %v550_v19  ;;  %721 = vst [vmem:[%s1702_s9 + $0x10] sm:$0xff] %v478_v20  ;;  %v553_v21 = vpop.f32.mrb[6].mxu1  ;;  %v481_v22 = vpop.f32.mrb[6].mxu0 }
 0x106   : > { %v554_v23 = vadd.f32 %v553_v21, %v1690_v58  ;;  %v482_v24 = vadd.f32 %v481_v22, %v1690_v58  ;;  %v555_v25 = vpop.f32.mrb[7].mxu1  ;;  %v483_v26 = vpop.f32.mrb[7].mxu0 }
 0x107   : > { %v556_v28 = vadd.f32 %v555_v25, %v1692_v59  ;;  %v484_v29 = vadd.f32 %v483_v26, %v1692_v59 }
 0x108   : > { %718 = vst [vmem:[%s1698_s16 + $0x78] sm:$0xff] %v554_v23  ;;  %706 = vst [vmem:[%s1698_s16 + $0x18] sm:$0xff] %v482_v24 }
 0x109   : > { %734 = vst [vmem:[%s1702_s9 + $0x78] sm:$0xff] %v556_v28  ;;  %722 = vst [vmem:[%s1702_s9 + $0x18] sm:$0xff] %v484_v29  ;;  %v1151_v30 = vpop.f32.mrb[8].mxu1  ;;  %v487_v31 = vpop.f32.mrb[8].mxu0 }
 0x10a   : > { %v630_v32 = vadd.f32 %v1151_v30, %v1724_v27  ;;  %v488_v33 = vadd.f32 %v487_v31, %v1690_v58  ;;  %v624_v34 = vpop.f32.mrb[9].mxu1  ;;  %v489_v35 = vpop.f32.mrb[9].mxu0 }
 0x10b   : > { %v625_v36 = vadd.f32 %v624_v34, %v1724_v27  ;;  %v490_v37 = vadd.f32 %v489_v35, %v1692_v59 }
 0x10c   : > { %v1094_v38 = vpack.c.bf16 %v630_v32, %v630_v32  ;;  %707 = vst [vmem:[%s1698_s16 + $0x20] sm:$0xff] %v488_v33 }
 0x10d   : > { %v1093_v39 = vpack.c.bf16 %v625_v36, %v625_v36  ;;  %723 = vst [vmem:[%s1702_s9 + $0x20] sm:$0xff] %v490_v37  ;;  %v1154_v40 = vpop.f32.mrb[10].mxu1  ;;  %v493_v41 = vpop.f32.mrb[10].mxu0 }
 0x10e   : > { %801 = vst.msk [vmem:[%s1738_s12 + $0x4] sm:$0xf] %vm799_vm1, %v1094_v38  ;;  %v640_v42 = vadd.f32 %v1154_v40, %v1724_v27  ;;  %v494_v43 = vadd.f32 %v493_v41, %v1690_v58  ;;  %v634_v44 = vpop.f32.mrb[11].mxu1  ;;  %v495_v45 = vpop.f32.mrb[11].mxu0 }
 0x10f   : > { %800 = vst.msk [vmem:[%s1738_s12] sm:$0xf] %vm799_vm1, %v1093_v39  ;;  %v635_v46 = vadd.f32 %v634_v44, %v1724_v27  ;;  %v496_v47 = vadd.f32 %v495_v45, %v1692_v59 }
 0x110   : > { %v1096_v48 = vpack.c.bf16 %v640_v42, %v640_v42  ;;  %708 = vst [vmem:[%s1698_s16 + $0x28] sm:$0xff] %v494_v43 }
 0x111   : > { %v1095_v49 = vpack.c.bf16 %v635_v46, %v635_v46  ;;  %724 = vst [vmem:[%s1702_s9 + $0x28] sm:$0xff] %v496_v47  ;;  %v1157_v50 = vpop.f32.mrb[12].mxu1  ;;  %v499_v51 = vpop.f32.mrb[12].mxu0 }
 0x112   : > { %803 = vst.msk [vmem:[%s1738_s12 + $0xc] sm:$0xf] %vm799_vm1, %v1096_v48  ;;  %v650_v52 = vadd.f32 %v1157_v50, %v1724_v27  ;;  %v500_v53 = vadd.f32 %v499_v51, %v1690_v58  ;;  %v644_v54 = vpop.f32.mrb[13].mxu1  ;;  %v501_v55 = vpop.f32.mrb[13].mxu0 }
 0x113   : > { %802 = vst.msk [vmem:[%s1738_s12 + $0x8] sm:$0xf] %vm799_vm1, %v1095_v49  ;;  %v645_v56 = vadd.f32 %v644_v54, %v1724_v27  ;;  %v502_v57 = vadd.f32 %v501_v55, %v1692_v59 }
 0x114   : > { %v1098_v60 = vpack.c.bf16 %v650_v52, %v650_v52  ;;  %709 = vst [vmem:[%s1698_s16 + $0x30] sm:$0xff] %v500_v53 }
 0x115   : > { %v1097_v61 = vpack.c.bf16 %v645_v56, %v645_v56  ;;  %725 = vst [vmem:[%s1702_s9 + $0x30] sm:$0xff] %v502_v57  ;;  %v1160_v62 = vpop.f32.mrb[14].mxu1  ;;  %v505_v63 = vpop.f32.mrb[14].mxu0 }
 0x116   : > { %805 = vst.msk [vmem:[%s1738_s12 + $0x14] sm:$0xf] %vm799_vm1, %v1098_v60  ;;  %v660_v0 = vadd.f32 %v1160_v62, %v1724_v27  ;;  %v506_v1 = vadd.f32 %v505_v63, %v1690_v58  ;;  %v654_v2 = vpop.f32.mrb[15].mxu1  ;;  %v507_v3 = vpop.f32.mrb[15].mxu0 }
 0x117   : > { %804 = vst.msk [vmem:[%s1738_s12 + $0x10] sm:$0xf] %vm799_vm1, %v1097_v61  ;;  %v655_v4 = vadd.f32 %v654_v2, %v1724_v27  ;;  %v508_v5 = vadd.f32 %v507_v3, %v1692_v59 }
 0x118   : > { %v1100_v6 = vpack.c.bf16 %v660_v0, %v660_v0  ;;  %710 = vst [vmem:[%s1698_s16 + $0x38] sm:$0xff] %v506_v1 }
 0x119   : > { %v1099_v7 = vpack.c.bf16 %v655_v4, %v655_v4  ;;  %726 = vst [vmem:[%s1702_s9 + $0x38] sm:$0xff] %v508_v5  ;;  %v1163_v8 = vpop.f32.mrb[16].mxu1  ;;  %v511_v9 = vpop.f32.mrb[16].mxu0 }
 0x11a   : > { %807 = vst.msk [vmem:[%s1738_s12 + $0x1c] sm:$0xf] %vm799_vm1, %v1100_v6  ;;  %v670_v10 = vadd.f32 %v1163_v8, %v1724_v27  ;;  %v512_v11 = vadd.f32 %v511_v9, %v1690_v58  ;;  %v664_v12 = vpop.f32.mrb[17].mxu1  ;;  %v513_v13 = vpop.f32.mrb[17].mxu0 }
 0x11b   : > { %806 = vst.msk [vmem:[%s1738_s12 + $0x18] sm:$0xf] %vm799_vm1, %v1099_v7  ;;  %v665_v14 = vadd.f32 %v664_v12, %v1724_v27  ;;  %v514_v15 = vadd.f32 %v513_v13, %v1692_v59 }
 0x11c   : > { %v1102_v16 = vpack.c.bf16 %v670_v10, %v670_v10  ;;  %711 = vst [vmem:[%s1698_s16 + $0x40] sm:$0xff] %v512_v11 }
 0x11d   : > { %v1101_v17 = vpack.c.bf16 %v665_v14, %v665_v14  ;;  %727 = vst [vmem:[%s1702_s9 + $0x40] sm:$0xff] %v514_v15  ;;  %v1166_v18 = vpop.f32.mrb[18].mxu1  ;;  %v517_v19 = vpop.f32.mrb[18].mxu0 }
 0x11e   : > { %809 = vst.msk [vmem:[%s1738_s12 + $0x24] sm:$0xf] %vm799_vm1, %v1102_v16  ;;  %v680_v20 = vadd.f32 %v1166_v18, %v1724_v27  ;;  %v518_v21 = vadd.f32 %v517_v19, %v1690_v58  ;;  %v674_v22 = vpop.f32.mrb[19].mxu1  ;;  %v519_v23 = vpop.f32.mrb[19].mxu0 }
 0x11f   : > { %808 = vst.msk [vmem:[%s1738_s12 + $0x20] sm:$0xf] %vm799_vm1, %v1101_v17  ;;  %v675_v24 = vadd.f32 %v674_v22, %v1724_v27  ;;  %v520_v25 = vadd.f32 %v519_v23, %v1692_v59 }
 0x120   : > { %v1104_v26 = vpack.c.bf16 %v680_v20, %v680_v20  ;;  %712 = vst [vmem:[%s1698_s16 + $0x48] sm:$0xff] %v518_v21 }
 0x121   : > { %v1103_v28 = vpack.c.bf16 %v675_v24, %v675_v24  ;;  %728 = vst [vmem:[%s1702_s9 + $0x48] sm:$0xff] %v520_v25  ;;  %v1169_v29 = vpop.f32.mrb[20].mxu1  ;;  %v523_v30 = vpop.f32.mrb[20].mxu0 }
 0x122   : > { %811 = vst.msk [vmem:[%s1738_s12 + $0x2c] sm:$0xf] %vm799_vm1, %v1104_v26  ;;  %v690_v31 = vadd.f32 %v1169_v29, %v1724_v27  ;;  %v524_v32 = vadd.f32 %v523_v30, %v1690_v58  ;;  %v684_v33 = vpop.f32.mrb[21].mxu1  ;;  %v525_v34 = vpop.f32.mrb[21].mxu0 }
 0x123   : > { %810 = vst.msk [vmem:[%s1738_s12 + $0x28] sm:$0xf] %vm799_vm1, %v1103_v28  ;;  %v685_v35 = vadd.f32 %v684_v33, %v1724_v27  ;;  %v526_v36 = vadd.f32 %v525_v34, %v1692_v59 }
 0x124   : > { %v1106_v37 = vpack.c.bf16 %v690_v31, %v690_v31  ;;  %713 = vst [vmem:[%s1698_s16 + $0x50] sm:$0xff] %v524_v32 }
 0x125   : > { %v1105_v38 = vpack.c.bf16 %v685_v35, %v685_v35  ;;  %729 = vst [vmem:[%s1702_s9 + $0x50] sm:$0xff] %v526_v36  ;;  %v1172_v39 = vpop.f32.mrb[22].mxu1  ;;  %v529_v40 = vpop.f32.mrb[22].mxu0 }
 0x126   : > { %813 = vst.msk [vmem:[%s1738_s12 + $0x34] sm:$0xf] %vm799_vm1, %v1106_v37  ;;  %v700_v41 = vadd.f32 %v1172_v39, %v1724_v27  ;;  %v530_v42 = vadd.f32 %v529_v40, %v1690_v58  ;;  %v694_v43 = vpop.f32.mrb[23].mxu1  ;;  %v531_v44 = vpop.f32.mrb[23].mxu0 }
 0x127   : > { %812 = vst.msk [vmem:[%s1738_s12 + $0x30] sm:$0xf] %vm799_vm1, %v1105_v38  ;;  %v1830_v45 = vadd.f32 %v694_v43, %v1724_v27  ;;  %v532_v46 = vadd.f32 %v531_v44, %v1692_v59 }
 0x128   : > { %v1108_v47 = vpack.c.bf16 %v700_v41, %v700_v41  ;;  %714 = vst [vmem:[%s1698_s16 + $0x58] sm:$0xff] %v530_v42 }
 0x129   : > { %v1107_v48 = vpack.c.bf16 %v1830_v45, %v1830_v45  ;;  %730 = vst [vmem:[%s1702_s9 + $0x58] sm:$0xff] %v532_v46 }
 0x12a   : > { %1305 = shalt.err (!%p1302_p7)
}
 0x12b   : > { %s1306_s16 = scalar_lea.hbm %s1807_s14, 2048  ;;  %s1310_s13 = scalar_lea.hbm %s1928_s3, 8192 }
 0x12c   : > { %p1307_p9 = scmp.ne.s32.totalorder %s1807_s14, %s1306_s16  ;;  %p1311_p12 = scmp.lt.u32.totalorder %s1807_s14, %s1928_s3 }
 0x12d   : > { %p1312_p13 = scmp.lt.u32.totalorder %s1310_s13, %s1306_s16  ;;  %p1314_p1 = scmp.lt.u32.totalorder %s1306_s16, %s1807_s14 }
 0x12e   : > { %p1308_p10 = pnand %p1307_p9, %p1506_p3 }
 0x12f   : > { %p1313_p0 = por %p1312_p13, %p1311_p12 }
 0x130   : > { %p1309_p11 = pneg %p1308_p10 }
 0x131   : > { %p1315_p2 = por %p1314_p1, %p1313_p0 }
 0x133   : > { %p1316_p4 = pnand %p1315_p2, %p1309_p11 }
 0x135   : > { %1319 = shalt.err (!%p1316_p4)
}
 0x136   : > { %s1422_s26 = smov 128   ;;  %s1423_s10 = smov 8   ;;  %815 = vst.msk [vmem:[%s1738_s12 + $0x3c] sm:$0xf] %vm799_vm1, %v1108_v47 }
 0x137   : > { %s1933_s22 = scalar_lea.sflag [#allocation3], %s1684_s8  ;;  %s1320_s9 = scalar_lea.vmem %s1833_s27, 2048 }
 0x138   : > { %1213 = dma.vmem_to_hbm [thread:$0]  (%p1506_p3), %s1821_s21, 2048, %s1807_s14, %s1933_s22, %s1422_s26, %s1422_s26, %s1423_s10  }
 0x139   : > { %p1321_p5 = scmp.ne.s32.totalorder %s1833_s27, %s1320_s9  ;;  %s1424_s17 = smov [#allocation4]  }
 0x13a   : > { %s1324_s13 = sshll.u32 %s1424_s17, 4  ;;  %s1325_s13 = int_to_ptr.vmem [resolvable:$false] %s1324_s13 }
 0x13b   : > { %p1322_p6 = pnand %p1321_p5, %p1506_p3  ;;  %s1326_s15 = scalar_lea.vmem %s1325_s13, 4096 }
 0x13c   : > { %p1327_p9 = scmp.lt.s32.totalorder %s1833_s27, %s1325_s13  ;;  %p1328_p10 = scmp.lt.s32.totalorder %s1326_s15, %s1320_s9 }
 0x13d   : > { %p1323_p7 = pneg %p1322_p6 }
 0x13e   : > { %p1329_p11 = por %p1328_p10, %p1327_p9 }
 0x140   : > { %p1330_p12 = pnand %p1329_p11, %p1323_p7 }
 0x142   : > { %1333 = shalt.err (!%p1330_p12)
}
 0x143   : > { %s1334_s21 = scalar_lea.hbm %s1816_s30, 2048  ;;  %s1338_s17 = scalar_lea.hbm %s1929_s4, 8192 }
 0x144   : > { %p1335_p13 = scmp.ne.s32.totalorder %s1816_s30, %s1334_s21  ;;  %p1339_p2 = scmp.lt.u32.totalorder %s1816_s30, %s1929_s4 }
 0x145   : > { %p1340_p4 = scmp.lt.u32.totalorder %s1338_s17, %s1334_s21  ;;  %p1342_p6 = scmp.lt.u32.totalorder %s1334_s21, %s1816_s30 }
 0x146   : > { %p1336_p0 = pnand %p1335_p13, %p1506_p3 }
 0x147   : > { %p1341_p5 = por %p1340_p4, %p1339_p2 }
 0x148   : > { %p1337_p1 = pneg %p1336_p0 }
 0x149   : > { %p1343_p7 = por %p1342_p6, %p1341_p5 }
 0x14b   : > { %p1344_p9 = pnand %p1343_p7, %p1337_p1 }
 0x14d   : > { %1347 = shalt.err (!%p1344_p9)
}
 0x14e   : > { %s1934_s9 = scalar_lea.sflag [#allocation5], %s1684_s8  ;;  %814 = vst.msk [vmem:[%s1738_s12 + $0x38] sm:$0xf] %vm799_vm1, %v1107_v48 }
 0x14f   : > { %1214 = dma.vmem_to_hbm [thread:$0]  (%p1506_p3), %s1833_s27, 2048, %s1816_s30, %s1934_s9, %s1422_s26, %s1422_s26, %s1423_s10  }
 0x150 PF: > { %p1224_p10 = scmp.ge.s32.totalorder %s1418_s25, 2  ;;  %s883_s16 = sand.u32 1, %s1390_s18  }
 0x151   : > { %s884_s6 = scalar_lea.sflag [#allocation3], %s883_s16 }
 0x152   : > { %p1218_p11 = pnand %p1224_p10, %p1515_p8 }
 0x154   : > { %1381 = dma.done.wait (!%p1218_p11), %s884_s6, 2048  }
 0x155   : > { %1383 = vsyncadd (!%p1218_p11), %s884_s6, 4294965248  ;;  %s893_s15 = scalar_lea.sflag [#allocation5], %s883_s16 }
 0x156   : > { %1385 = dma.done.wait (!%p1218_p11), %s893_s15, 2048  }
 0x157   : > { %1387 = vsyncadd (!%p1218_p11), %s893_s15, 4294965248  ;;  %s22_s25 = sadd.s32 1, %s1418_s25   ;;  %s1935_s18 = smov %s1394_s19 }
 0x158   : > { %p19_p12 = scmp.ge.s32.totalorder %s22_s25, 6   ;;  %s1936_s19 = smov %s1398_s20 }
 0x159   : > { %s1937_s20 = smov %s1524_s11  ;;  %s1938_s21 = smov %s1410_s23 }
 0x15a   : > { %s1939_s22 = smov %s1414_s24  ;;  %s1940_s23 = smov %s1943_s28 }
 0x15b   : > { %s1941_s24 = smov %s1947_s29  ;;  %21 = sbr.rel (!%p19_p12) target bundleno = 7 (0x7), region = 96 }
 0x162   :  { %910 = vsyncpa [#allocation3], 1 }
 0x163   :  { %912 = vsyncpa [#allocation3 + $0x1], 1 }
 0x164   :  { %913 = vsyncpa [#allocation5], 1 }
 0x165   :  { %915 = vsyncpa [#allocation5 + $0x1], 1 }

</bundles_post_ra>
